<compile_context>
chip_gen: v6e
topology: v6e:2x2x1
jax: 0.10.0
libtpu: 0.0.40
codegen_flags: <defaults>
</compile_context>

<pallas_src>
import functools

import jax
import jax.numpy as jnp
from jax.experimental import pallas as pl
from jax.experimental.pallas import tpu as pltpu


def mlp_kernel(w1_ref, b1_ref, w2_ref, b2_ref, w3_ref, b3_ref, x_ref, o_ref):
    # x_ref: (8, TB)  -- batch on lanes.  Weights are (out, in), biases (out, 1).
    x = x_ref[...]

    # hidden1: (12, 8) @ (8, TB) + (12, 1) -> ReLU
    h1 = jnp.dot(w1_ref[...], x, preferred_element_type=jnp.float32) + b1_ref[...]
    h1 = jnp.maximum(h1, 0.0)

    # hidden2: (8, 12) @ (12, TB) + (8, 1) -> ReLU
    h2 = jnp.dot(w2_ref[...], h1, preferred_element_type=jnp.float32) + b2_ref[...]
    h2 = jnp.maximum(h2, 0.0)

    # output: (1, 8) @ (8, TB) + (1, 1) -> Sigmoid
    logits = jnp.dot(w3_ref[...], h2, preferred_element_type=jnp.float32) + b3_ref[...]

    # Sigmoid via EUP exp + reciprocal (keeps the VALU free; the tiny compute
    # stays hidden under the HBM-bound x / out DMAs).
    o_ref[...] = pl.reciprocal(1.0 + jnp.exp(-logits), approx=False).astype(o_ref.dtype)


@functools.partial(jax.jit, static_argnames=("tb",))
def neural_net_forward(x, params, *, tb=512):
    """x: (B, 8) float32.  params: PyTorch-layout weights (out, in), biases (out, 1).

    Returns (B, 1) float32, matching NeuralNet.forward.
    NOTE: for genuinely tiny B this is launch/DMA-overhead dominated; the
    lane-dense tiling only pays off at large batch, but it is correct for all B.
    """
    B = x.shape[0]
    # Batch tile: multiple of 128 lanes (lane-dense, unmasked stores).  Pad B
    # up to a multiple of tb; padded columns are junk and sliced off below.
    n_tiles = -(-B // tb)
    bp = n_tiles * tb
    x_t = jnp.pad(x, ((0, bp - B), (0, 0))).T  # (8, Bp): batch on lanes

    w1, b1 = params["w1"], params["b1"]  # (12, 8), (12, 1)
    w2, b2 = params["w2"], params["b2"]  # (8, 12), (8, 1)
    w3, b3 = params["w3"], params["b3"]  # (1, 8),  (1, 1)

    n_param_bytes = sum(p.size for p in (w1, b1, w2, b2, w3, b3)) * 4
    cost = pl.CostEstimate(
        flops=2 * bp * (8 * 12 + 12 * 8 + 8 * 1),
        transcendentals=bp,                       # one exp per output element
        bytes_accessed=bp * (8 + 1) * 4 + n_param_bytes,
    )

    const = lambda i: (0, 0)  # weights/biases: same (full) block every step -> VMEM-resident
    out_t = pl.pallas_call(
        mlp_kernel,
        out_shape=jax.ShapeDtypeStruct((1, bp), jnp.float32),
        grid=(n_tiles,),
        in_specs=[
            pl.BlockSpec((12, 8), const),   # w1
            pl.BlockSpec((12, 1), const),   # b1
            pl.BlockSpec((8, 12), const),   # w2
            pl.BlockSpec((8, 1), const),    # b2
            pl.BlockSpec((1, 8), const),    # w3
            pl.BlockSpec((1, 1), const),    # b3
            pl.BlockSpec((8, tb), lambda i: (0, i)),   # x  (streamed over batch)
        ],
        out_specs=pl.BlockSpec((1, tb), lambda i: (0, i)),
        compiler_params=pltpu.CompilerParams(
            dimension_semantics=("parallel",),   # shard batch across TCs (v7x megacore)
        ),
        cost_estimate=cost,
    )(w1, b1, w2, b2, w3, b3, x_t)

    return out_t[0, :B][:, None]  # back to (B, 1)


def init_params(key):
    """Deterministic init mirroring nn.Linear: weight (out, in), bias (out, 1)."""
    k1, k2, k3, k4, k5, k6 = jax.random.split(key, 6)

    def uniform(k, shape, fan_in):
        bound = 1.0 / jnp.sqrt(fan_in)
        return jax.random.uniform(k, shape, jnp.float32, -bound, bound)

    return {
        "w1": uniform(k1, (12, 8), 8),
        "b1": uniform(k2, (12, 1), 8),
        "w2": uniform(k3, (8, 12), 12),
        "b2": uniform(k4, (8, 1), 12),
        "w3": uniform(k5, (1, 8), 8),
        "b3": uniform(k6, (1, 1), 8),
    }


if __name__ == "__main__":
    key = jax.random.PRNGKey(0)
    kx, kp = jax.random.split(key)

    B = 8
    x = jax.random.normal(kx, (B, 8), dtype=jnp.float32)
    params = init_params(kp)

    out = neural_net_forward(x, params)
    jax.block_until_ready(out)

    # Plain-JAX reference (nn.Linear semantics: y = x @ W.T + b).
    h1 = jnp.maximum(x @ params["w1"].T + params["b1"].T, 0.0)
    h2 = jnp.maximum(h1 @ params["w2"].T + params["b2"].T, 0.0)
    ref = jax.nn.sigmoid(h2 @ params["w3"].T + params["b3"].T)

    assert out.shape == (B, 1)
    assert jnp.allclose(out, ref, atol=1e-5, rtol=1e-5)

    print("KERNEL_OK")
</pallas_src>

<mosaic_0001>
module attributes {stable_mosaic.version = 11 : i64} {
  func.func @mlp_kernel(%arg0: i32, %arg1: memref<12x8xf32, #tpu.memory_space<vmem>>, %arg2: memref<12x1xf32, #tpu.memory_space<vmem>>, %arg3: memref<8x12xf32, #tpu.memory_space<vmem>>, %arg4: memref<8x1xf32, #tpu.memory_space<vmem>>, %arg5: memref<1x8xf32, #tpu.memory_space<vmem>>, %arg6: memref<1x1xf32, #tpu.memory_space<vmem>>, %arg7: memref<8x512xf32, #tpu.memory_space<vmem>>, %arg8: memref<1x512xf32, #tpu.memory_space<vmem>>) attributes {dimension_semantics = [#tpu.dimension_semantics<parallel>], iteration_bounds = array<i64: 1>, scalar_prefetch = 0 : i64, scratch_operands = 0 : i64, tpu.core_type = #tpu.core_type<tc>, window_params = [{pipeline_mode = #tpu.pipeline_mode<synchronous>, transform_indices = @transform_0, window_bounds = array<i64: 12, 8>}, {pipeline_mode = #tpu.pipeline_mode<synchronous>, transform_indices = @transform_1, window_bounds = array<i64: 12, 1>}, {pipeline_mode = #tpu.pipeline_mode<synchronous>, transform_indices = @transform_2, window_bounds = array<i64: 8, 12>}, {pipeline_mode = #tpu.pipeline_mode<synchronous>, transform_indices = @transform_3, window_bounds = array<i64: 8, 1>}, {pipeline_mode = #tpu.pipeline_mode<synchronous>, transform_indices = @transform_4, window_bounds = array<i64: 1, 8>}, {pipeline_mode = #tpu.pipeline_mode<synchronous>, transform_indices = @transform_5, window_bounds = array<i64: 1, 1>}, {transform_indices = @transform_6, window_bounds = array<i64: 8, 512>}, {transform_indices = @transform_7, window_bounds = array<i64: 1, 512>}]} {
    %c0 = arith.constant 0 : index
    %c0_0 = arith.constant 0 : index
    %0 = vector.load %arg7[%c0, %c0_0] : memref<8x512xf32, #tpu.memory_space<vmem>>, vector<8x512xf32>
    %c0_1 = arith.constant 0 : index
    %c0_2 = arith.constant 0 : index
    %1 = vector.load %arg1[%c0_1, %c0_2] : memref<12x8xf32, #tpu.memory_space<vmem>>, vector<12x8xf32>
    %cst = arith.constant dense<0.000000e+00> : vector<12x512xf32>
    %2 = tpu.matmul %1, %0, %cst {dimension_numbers = #tpu.dot_dimension_numbers<[1], [0], [0], [1], [0, 0, 1, 1], [], []>} : vector<12x8xf32>, vector<8x512xf32>, vector<12x512xf32> -> vector<12x512xf32>
    %c0_3 = arith.constant 0 : index
    %c0_4 = arith.constant 0 : index
    %3 = vector.load %arg2[%c0_3, %c0_4] : memref<12x1xf32, #tpu.memory_space<vmem>>, vector<12x1xf32>
    %4 = vector.broadcast %3 : vector<12x1xf32> to vector<12x512xf32>
    %5 = arith.addf %2, %4 : vector<12x512xf32>
    %cst_5 = arith.constant 0.000000e+00 : f32
    %6 = vector.broadcast %cst_5 : f32 to vector<12x512xf32>
    %7 = arith.maximumf %5, %6 : vector<12x512xf32>
    %c0_6 = arith.constant 0 : index
    %c0_7 = arith.constant 0 : index
    %8 = vector.load %arg3[%c0_6, %c0_7] : memref<8x12xf32, #tpu.memory_space<vmem>>, vector<8x12xf32>
    %cst_8 = arith.constant dense<0.000000e+00> : vector<8x512xf32>
    %9 = tpu.matmul %8, %7, %cst_8 {dimension_numbers = #tpu.dot_dimension_numbers<[1], [0], [0], [1], [0, 0, 1, 1], [], []>} : vector<8x12xf32>, vector<12x512xf32>, vector<8x512xf32> -> vector<8x512xf32>
    %c0_9 = arith.constant 0 : index
    %c0_10 = arith.constant 0 : index
    %10 = vector.load %arg4[%c0_9, %c0_10] : memref<8x1xf32, #tpu.memory_space<vmem>>, vector<8x1xf32>
    %11 = vector.broadcast %10 : vector<8x1xf32> to vector<8x512xf32>
    %12 = arith.addf %9, %11 : vector<8x512xf32>
    %cst_11 = arith.constant 0.000000e+00 : f32
    %13 = vector.broadcast %cst_11 : f32 to vector<8x512xf32>
    %14 = arith.maximumf %12, %13 : vector<8x512xf32>
    %c0_12 = arith.constant 0 : index
    %c0_13 = arith.constant 0 : index
    %15 = vector.load %arg5[%c0_12, %c0_13] : memref<1x8xf32, #tpu.memory_space<vmem>>, vector<1x8xf32>
    %cst_14 = arith.constant dense<0.000000e+00> : vector<1x512xf32>
    %16 = tpu.matmul %15, %14, %cst_14 {dimension_numbers = #tpu.dot_dimension_numbers<[1], [0], [0], [1], [0, 0, 1, 1], [], []>} : vector<1x8xf32>, vector<8x512xf32>, vector<1x512xf32> -> vector<1x512xf32>
    %c0_15 = arith.constant 0 : index
    %c0_16 = arith.constant 0 : index
    %17 = vector.load %arg6[%c0_15, %c0_16] : memref<1x1xf32, #tpu.memory_space<vmem>>, vector<1x1xf32>
    %18 = vector.broadcast %17 : vector<1x1xf32> to vector<1x512xf32>
    %19 = arith.addf %16, %18 : vector<1x512xf32>
    %cst_17 = arith.constant 0.000000e+00 : f32
    %20 = vector.broadcast %cst_17 : f32 to vector<1x512xf32>
    %21 = arith.subf %20, %19 : vector<1x512xf32>
    %22 = math.exp %21 : vector<1x512xf32>
    %cst_18 = arith.constant 1.000000e+00 : f32
    %23 = vector.broadcast %cst_18 : f32 to vector<1x512xf32>
    %24 = arith.addf %23, %22 : vector<1x512xf32>
    %25 = tpu.reciprocal %24 : vector<1x512xf32> -> vector<1x512xf32>
    %c0_19 = arith.constant 0 : index
    %c0_20 = arith.constant 0 : index
    %26 = vector.load %arg8[%c0_19, %c0_20] : memref<1x512xf32, #tpu.memory_space<vmem>>, vector<1x512xf32>
    tpu.vector_store %arg8[%c0_19, %c0_20], %25 {strides = array<i32>} : memref<1x512xf32, #tpu.memory_space<vmem>>, vector<1x512xf32>,
    return
  }
  func.func @transform_0(%arg0: i32) -> (i32, i32) {
    %c0_i32 = arith.constant 0 : i32
    %c0_i32_0 = arith.constant 0 : i32
    %c0_i32_1 = arith.constant 0 : i32
    return %c0_i32, %c0_i32_0 : i32, i32
  }
  func.func @transform_1(%arg0: i32) -> (i32, i32) {
    %c0_i32 = arith.constant 0 : i32
    %c0_i32_0 = arith.constant 0 : i32
    %c0_i32_1 = arith.constant 0 : i32
    return %c0_i32, %c0_i32_0 : i32, i32
  }
  func.func @transform_2(%arg0: i32) -> (i32, i32) {
    %c0_i32 = arith.constant 0 : i32
    %c0_i32_0 = arith.constant 0 : i32
    %c0_i32_1 = arith.constant 0 : i32
    return %c0_i32, %c0_i32_0 : i32, i32
  }
  func.func @transform_3(%arg0: i32) -> (i32, i32) {
    %c0_i32 = arith.constant 0 : i32
    %c0_i32_0 = arith.constant 0 : i32
    %c0_i32_1 = arith.constant 0 : i32
    return %c0_i32, %c0_i32_0 : i32, i32
  }
  func.func @transform_4(%arg0: i32) -> (i32, i32) {
    %c0_i32 = arith.constant 0 : i32
    %c0_i32_0 = arith.constant 0 : i32
    %c0_i32_1 = arith.constant 0 : i32
    return %c0_i32, %c0_i32_0 : i32, i32
  }
  func.func @transform_5(%arg0: i32) -> (i32, i32) {
    %c0_i32 = arith.constant 0 : i32
    %c0_i32_0 = arith.constant 0 : i32
    %c0_i32_1 = arith.constant 0 : i32
    return %c0_i32, %c0_i32_0 : i32, i32
  }
  func.func @transform_6(%arg0: i32) -> (i32, i32) {
    %c0_i32 = arith.constant 0 : i32
    %c0_i32_0 = arith.constant 0 : i32
    return %c0_i32, %arg0 : i32, i32
  }
  func.func @transform_7(%arg0: i32) -> (i32, i32) {
    %c0_i32 = arith.constant 0 : i32
    %c0_i32_0 = arith.constant 0 : i32
    return %c0_i32, %arg0 : i32, i32
  }
}

</mosaic_0001>

<bundles_post_ra>
// kernel: neural_net_forward.1
= control target key start
LH: loop header
LB: loop body
LE: loop exit
PB: predicated region body
PF: predicated region fallthrough
CT: control target
= control target key end

     0   :  { %v632_v3 = vmov 0.0   ;;  %vm46_vm0 = vcmask 64512   ;;  %v633_v8 = vmov 0   ;;  %vm226_vm1 = vcmask 1043456   ;;  %s728_s6 = inlined_call_operand.vmem [shape: f32[8,512], index: 6, kind: input, shape index: {}]   ;;  %s729_s0 = inlined_call_operand.vmem [shape: f32[12,8], index: 0, kind: input, shape index: {}]   ;;  %s730_s1 = inlined_call_operand.vmem [shape: f32[12,1], index: 1, kind: input, shape index: {}]   ;;  %s731_s3 = inlined_call_operand.vmem [shape: f32[8,1], index: 3, kind: input, shape index: {}]   ;;  %s732_s5 = inlined_call_operand.<no memory space> [shape: f32[1,1], index: 5, kind: input, shape index: {}]   ;;  %s733_s2 = inlined_call_operand.vmem [shape: f32[8,12], index: 2, kind: input, shape index: {}]   ;;  %s734_s4 = inlined_call_operand.vmem [shape: f32[1,8], index: 4, kind: input, shape index: {}]   ;;  %s735_s7 = inlined_call_operand.vmem [shape: f32[1,512], index: 7, kind: output, shape index: {}]  }
   0x1   :  { %v29_v0 = vld [vmem:[%s728_s6 + $0x8] sm:$0xff]  ;;  %v31_v1 = vld [vmem:[%s728_s6 + $0x18] sm:$0xff]  ;;  %v28_v2 = vld [vmem:[%s728_s6] sm:$0xff]  ;;  %117 = vmatprep.mubr.f32.mxu0 %v632_v3  ;;  %194 = vmatprep.mubr.f32.mxu1 %v632_v3  ;;  %v12_v11 = vstv %s732_s5  ;;  %vm222_vm2 = vcmask 97280   ;;  %v392_v54 = vlaneseq }
   0x2   :  { %83 = vmatprep.subr.mxu0 %v29_v0  ;;  %160 = vmatprep.subr.mxu1 %v31_v1  ;;  %v30_v4 = vld [vmem:[%s728_s6 + $0x10] sm:$0xff]  ;;  %v32_v5 = vld [vmem:[%s729_s0] sm:$0xff]  ;;  %v35_v6 = vld [vmem:[%s730_s1 + $0x8] sm:$0xf]  ;;  %13 = vst [vmem:[#allocation2] sm:$0x1] %v12_v11 }
   0x3   :  { %84 = vmatpush1.msra.mxu0 %v28_v2  ;;  %161 = vmatpush1.msra.mxu1 %v30_v4  ;;  %v33_v7 = vld [vmem:[%s729_s0 + $0x8] sm:$0xf]  ;;  %v34_v9 = vld [vmem:[%s730_s1] sm:$0xff]  ;;  %v393_v55 = vshrl.u32 %v392_v54, 7  ;;  %vm592_vm3 = vcmp.lt.s32.totalorder %v392_v54, 512 }
   0x4   :  { %599 = vmatmul.mubr.msk.f32.vlgmr.msra.gmra.mxu0 %vm46_vm0, %v32_v5  ;;  %601 = vmatmul.mubr.msk.f32.vlgmr.msra.gmra.mxu1 %vm46_vm0, %v32_v5  ;;  %v216_v10 = vld [vmem:[%s731_s3] sm:$0xff] }
   0x5   :  { %123 = vmatprep.mubr.f32.mxu0 %v632_v3  ;;  %200 = vmatprep.mubr.f32.mxu1 %v632_v3  ;;  %v215_v39 = vld [vmem:[%s733_s2] sm:$0xff]  ;;  %v394_v56 = vsub.s32 0, %v393_v55 }
   0x6   :  { %614 = vset.pattern.permute.xlu0 %v633_v8  ;;  %615 = vset.pattern.permute.xlu1 %v633_v8  ;;  %v385_v53 = vld [vmem:[%s734_s4] sm:$0x1] }
   0x7   :  { %43 = vperm.xlu0 %614, %v35_v6   ;;  %219 = vperm.xlu1 %615, %v216_v10  }
   0x8   :  { %600 = vmatmul.mubr.msk.f32.gmra.mxu0 %vm46_vm0, %v33_v7  ;;  %602 = vmatmul.mubr.msk.f32.gmra.mxu1 %vm46_vm0, %v33_v7 }
   0x9   :  { %303 = vmatprep.mubr.f32.mxu0 %v632_v3  ;;  %374 = vmatprep.mubr.f32.mxu1 %v632_v3  ;;  %v386_v12 = vld [vmem:[#allocation2] sm:$0x1] }
   0xb   :  { %38 = vperm.xlu0 %614, %v34_v9   ;;  %389 = vperm.xlu1 %615, %v386_v12  }
  0x82   :  { %v44_v13 = vpop.permute.xlu0 %43  ;;  %v220_v42 = vpop.permute.xlu1 %219 }
  0x86   :  { %v39_v20 = vpop.permute.xlu0 %38  ;;  %v390_v57 = vpop.permute.xlu1 %389 }
  0x87   :  { %v395_v58 = vrot.slane %v390_v57, %v394_v56 }
  0xc4   :  { %v119_v14 = vpop.f32.mrf.mxu0  ;;  %v196_v15 = vpop.f32.mrf.mxu1 }
  0xc5   :  { %v120_v29 = vadd.f32 %v119_v14, %v39_v20  ;;  %v197_v30 = vadd.f32 %v196_v15, %v39_v20 }
  0xc6   :  { %v121_v16 = vpop.f32.mrf.mxu0  ;;  %v198_v17 = vpop.f32.mrf.mxu1 }
  0xc7   :  { %v122_v25 = vadd.f32 %v121_v16, %v39_v20  ;;  %v199_v26 = vadd.f32 %v198_v17, %v39_v20  ;;  %v207_v37 = vmax.f32 %v120_v29, 0.0  ;;  %v209_v38 = vmax.f32 %v197_v30, 0.0 }
  0xc8   :  { %v125_v18 = vpop.f32.mrf.mxu0  ;;  %v202_v19 = vpop.f32.mrf.mxu1 }
  0xc9   :  { %v126_v21 = vadd.f32 %v125_v18, %v44_v13  ;;  %v203_v22 = vadd.f32 %v202_v19, %v44_v13  ;;  %v208_v35 = vmax.f32 %v122_v25, 0.0  ;;  %v210_v36 = vmax.f32 %v199_v26, 0.0 }
  0xca   :  { %v127_v23 = vpop.f32.mrf.mxu0  ;;  %v204_v24 = vpop.f32.mrf.mxu1  ;;  %v634_v19 = vmov 1966171168  }
  0xcb   :  { %v128_v27 = vadd.f32 %v127_v23, %v44_v13  ;;  %v205_v28 = vadd.f32 %v204_v24, %v44_v13  ;;  %v211_v33 = vmax.f32 %v126_v21, 0.0  ;;  %v213_v34 = vmax.f32 %v203_v22, 0.0 }
  0xcc   :  { %v568_v20 = vunpack.c.l.s4 %v634_v19 }
  0xcd   :  { %v212_v31 = vmax.f32 %v128_v27, 0.0  ;;  %v214_v32 = vmax.f32 %v205_v28, 0.0 }
  0xce   :  { %v569_v21 = vunpack.c.0.s8 %v568_v20 }
  0xcf   :  { %603 = vmatprep.subr.msk.mxu0 %vm226_vm1, %v212_v31  ;;  %606 = vmatprep.subr.msk.mxu1 %vm226_vm1, %v214_v32 }
  0xd0   :  { %604 = vmatpush1.msk.msra.mxu0 %vm226_vm1, %v211_v33  ;;  %607 = vmatpush1.msk.msra.mxu1 %vm226_vm1, %v213_v34  ;;  %v572_v24 = vsub.s32 %v569_v21, %v393_v55 }
  0xd1   :  { %269 = vmatprep.subr.mxu0 %v208_v35  ;;  %340 = vmatprep.subr.mxu1 %v210_v36 }
  0xd2   :  { %270 = vmatpush1.msra.mxu0 %v207_v37  ;;  %341 = vmatpush1.msra.mxu1 %v209_v38 }
  0xd3   :  { %605 = vmatmul.mubr.msk.f32.vlgmr.msra.gmra.mxu0 %vm222_vm2, %v215_v39  ;;  %608 = vmatmul.mubr.msk.f32.vlgmr.msra.gmra.mxu1 %vm222_vm2, %v215_v39 }
  0xd4   :  { %463 = vmatprep.mubr.f32.mxu0 %v632_v3  ;;  %534 = vmatprep.mubr.f32.mxu1 %v632_v3 }
 0x193   :  { %v305_v40 = vpop.f32.mrf.mxu0  ;;  %v376_v41 = vpop.f32.mrf.mxu1 }
 0x194   :  { %v306_v43 = vadd.f32 %v305_v40, %v220_v42  ;;  %v377_v44 = vadd.f32 %v376_v41, %v220_v42 }
 0x195   :  { %v307_v45 = vpop.f32.mrf.mxu0  ;;  %v378_v46 = vpop.f32.mrf.mxu1 }
 0x196   :  { %v308_v47 = vadd.f32 %v307_v45, %v220_v42  ;;  %v379_v48 = vadd.f32 %v378_v46, %v220_v42  ;;  %v381_v51 = vmax.f32 %v306_v43, 0.0  ;;  %v383_v52 = vmax.f32 %v377_v44, 0.0 }
 0x198   :  { %v382_v49 = vmax.f32 %v308_v47, 0.0  ;;  %v384_v50 = vmax.f32 %v379_v48, 0.0 }
 0x19a   :  { %429 = vmatprep.subr.mxu0 %v382_v49  ;;  %500 = vmatprep.subr.mxu1 %v384_v50 }
 0x19b   :  { %430 = vmatpush1.msra.mxu0 %v381_v51  ;;  %501 = vmatpush1.msra.mxu1 %v383_v52 }
 0x19c   :  { %609 = vmatmul.mubr.msk.f32.vlgmr.msra.gmra.mxu0 %vm46_vm0, %v385_v53  ;;  %610 = vmatmul.mubr.msk.f32.vlgmr.msra.gmra.mxu1 %vm46_vm0, %v385_v53 }
 0x25c   :  { %v465_v59 = vpop.f32.mrf.mxu0  ;;  %v536_v60 = vpop.f32.mrf.mxu1 }
 0x25d   :  { %v466_v61 = vadd.f32 %v465_v59, %v395_v58  ;;  %v537_v62 = vadd.f32 %v536_v60, %v395_v58 }
 0x25e   :  { %v467_v63 = vpop.f32.mrf.mxu0  ;;  %v538_v0 = vpop.f32.mrf.mxu1 }
 0x25f   :  { %v541_v1 = vsub.f32 0.0, %v466_v61  ;;  %v543_v2 = vsub.f32 0.0, %v537_v62  ;;  %v468_v3 = vadd.f32 %v467_v63, %v395_v58  ;;  %v539_v4 = vadd.f32 %v538_v0, %v395_v58 }
 0x261   :  { %v545_v5 = vmul.f32 1.442695, %v541_v1  ;;  %v549_v6 = vmul.f32 1.442695, %v543_v2  ;;  %v542_v7 = vsub.f32 0.0, %v468_v3  ;;  %v544_v8 = vsub.f32 0.0, %v539_v4 }
 0x263   :  { %616 = vpow2.f32 %v545_v5  ;;  %v547_v9 = vmul.f32 1.442695, %v542_v7  ;;  %v551_v10 = vmul.f32 1.442695, %v544_v8 }
 0x264   :  { %618 = vpow2.f32 %v549_v6 }
 0x265   :  { %620 = vpow2.f32 %v547_v9 }
 0x266   :  { %622 = vpow2.f32 %v551_v10 }
 0x270   :  { %v617_v11 = vpop.eup %616 }
 0x271   :  { %v619_v12 = vpop.eup %618  ;;  %v553_v13 = vadd.f32 1.0, %v617_v11 }
 0x272   :  { %v621_v14 = vpop.eup %620  ;;  %v555_v15 = vadd.f32 1.0, %v619_v12 }
 0x273   :  { %v623_v16 = vpop.eup %622  ;;  %624 = vrcp.f32 %v553_v13  ;;  %v554_v17 = vadd.f32 1.0, %v621_v14 }
 0x274   :  { %626 = vrcp.f32 %v555_v15  ;;  %v556_v18 = vadd.f32 1.0, %v623_v16 }
 0x275   :  { %628 = vrcp.f32 %v554_v17 }
 0x276   :  { %630 = vrcp.f32 %v556_v18 }
 0x280   :  { %v625_v22 = vpop.eup %624 }
 0x281   :  { %v627_v23 = vpop.eup %626 }
 0x282   :  { %v629_v25 = vpop.eup %628 }
 0x283   :  { %v631_v26 = vpop.eup %630  ;;  %v565_v27 = vcombine.low %v625_v22, %v629_v25 }
 0x284   :  { %v566_v28 = vcombine.low %v627_v23, %v631_v26 }
 0x285   :  { %v573_v29 = vrot.slane %v565_v27, %v572_v24 }
 0x286   :  { %v580_v30 = vrot.slane %v566_v28, %v572_v24 }
 0x288   :  { %v581_v31 = vcombine.low %v573_v29, %v580_v30 }
 0x28a   :  { %v588_v32 = vrot.slane %v581_v31, %v572_v24 }
 0x28c   :  { %594 = vst.msk [vmem:[%s735_s7] sm:$0xf] %vm592_vm3, %v588_v32 }

</bundles_post_ra>
